<compile_context>
chip_gen: v7x
topology: tpu7x:2x2x1
jax: 0.10.0
libtpu: 0.0.40
codegen_flags: <defaults>
</compile_context>

<pallas_src>
import functools

import jax
import jax.numpy as jnp
from jax import lax
from jax.experimental import pallas as pl
from jax.experimental.pallas import tpu as pltpu


def _round_up(a: int, b: int) -> int:
    return -(-a // b) * b


def _tile_bytes(rows: int, cols: int, dtype) -> int:
    """Physical VMEM bytes of a (rows, cols) tile: sublane/lane padded, dtype-packed."""
    it = jnp.dtype(dtype).itemsize
    sub = 8 * max(1, 4 // it)            # 8 rows f32, 16 bf16, 32 int8/fp8
    return _round_up(max(rows, 1), sub) * _round_up(max(cols, 1), 128) * it


_VMEM_BUDGET = 16 * 1024 * 1024          # design target for the working set
_VMEM_LIMIT = 32 * 1024 * 1024           # scoped-VMEM limit requested from Mosaic


# --------------------------------------------------------------------------- #
# Kernels
# --------------------------------------------------------------------------- #
def _conv1d_single_tile_kernel(x_ref, w_ref, b_ref, o_ref, *,
                               k_taps, dilation, pad_lo, pad_hi, cdt):
    # x_ref: (1, Cin, T)   w_ref: (K, Cout, Cin)   b_ref: (Cout, 1)   o_ref: (1, Cout, Tout)
    x = x_ref[0].astype(cdt)                                   # (Cin, T)
    c_in = x.shape[0]
    parts = []
    if pad_lo > 0:
        parts.append(jnp.zeros((c_in, pad_lo), cdt))
    parts.append(x)
    if pad_hi > 0:
        parts.append(jnp.zeros((c_in, pad_hi), cdt))
    xw = parts[0] if len(parts) == 1 else jnp.concatenate(parts, axis=1)
    t_out = o_ref.shape[2]

    acc = jnp.dot(w_ref[0], xw[:, 0:t_out], preferred_element_type=jnp.float32)
    for i in range(1, k_taps):                                 # K is small & static
        off = i * dilation
        acc = acc + jnp.dot(w_ref[i], xw[:, off:off + t_out],
                            preferred_element_type=jnp.float32)
    o_ref[0] = (acc + b_ref[...].astype(jnp.float32)).astype(o_ref.dtype)


def _conv1d_tiled_kernel(xm_ref, xh_ref, w_ref, b_ref, o_ref, *,
                         k_taps, dilation, tile_cols, halo, cdt):
    # xm_ref: (1, Cin, TT) main tile;  xh_ref: (1, Cin, HB) right-halo block.
    body_w = tile_cols - halo
    bias = b_ref[...].astype(jnp.float32)                      # (Cout, 1)

    # Body outputs [0, TT - halo): every tap reads only the main tile.
    body = jnp.dot(w_ref[0], xm_ref[0, :, 0:body_w].astype(cdt),
                   preferred_element_type=jnp.float32)
    for i in range(1, k_taps):
        off = i * dilation
        body = body + jnp.dot(w_ref[i], xm_ref[0, :, off:off + body_w].astype(cdt),
                              preferred_element_type=jnp.float32)
    o_ref[0, :, 0:body_w] = (body + bias).astype(o_ref.dtype)

    # Tail outputs [TT - halo, TT): tiny (Cin, 2*halo) window straddling the
    # tile boundary (last `halo` main cols + first `halo` halo cols).
    sw = jnp.concatenate([xm_ref[0, :, body_w:].astype(cdt),
                          xh_ref[0, :, 0:halo].astype(cdt)], axis=1)
    tail = jnp.dot(w_ref[0], sw[:, 0:halo], preferred_element_type=jnp.float32)
    for i in range(1, k_taps):
        off = i * dilation
        tail = tail + jnp.dot(w_ref[i], sw[:, off:off + halo],
                              preferred_element_type=jnp.float32)
    o_ref[0, :, body_w:] = (tail + bias).astype(o_ref.dtype)


def _conv1d_pointwise_kernel(xm_ref, w_ref, b_ref, o_ref, *, cdt):
    # K == 1: no halo, a single matmul per tile.
    o_ref[0] = (jnp.dot(w_ref[0], xm_ref[0].astype(cdt),
                        preferred_element_type=jnp.float32)
                + b_ref[...].astype(jnp.float32)).astype(o_ref.dtype)


# --------------------------------------------------------------------------- #
# Wrapper
# --------------------------------------------------------------------------- #
def conv_norm(x, weight, bias=None, *, stride=1, padding=None, dilation=1,
              transform=False, compute_dtype=None, max_tile_cols=None):
    """ConvNorm forward.

    x       : [B, Cin, T]  (transform=False)  or  [B, T, Cin]  (transform=True)
    weight  : [Cout, Cin, K]   (PyTorch Conv1d layout)
    bias    : [Cout] or None
    compute_dtype : optional matmul operand dtype (e.g. jnp.bfloat16 on
                    v6e/v7x); accumulation is always float32.
    max_tile_cols : optional cap on the time-tile width (testing / tuning).
    """
    c_out, c_in, k_taps = weight.shape
    if padding is None:
        assert k_taps % 2 == 1
        padding = dilation * (k_taps - 1) // 2

    # transform=True mirrors the PyTorch module (transpose -> conv -> transpose).
    # TODO(synk): a time-major kernel variant would avoid these two HBM passes.
    xt = jnp.transpose(x, (0, 2, 1)) if transform else x          # [B, Cin, T]
    b_sz, ci, t_len = xt.shape
    assert ci == c_in

    halo = dilation * (k_taps - 1)
    t_out = t_len + 2 * padding - halo                            # stride-1 length
    assert t_out >= 1, "input too short for this kernel/dilation/padding"

    cdt = jnp.dtype(compute_dtype) if compute_dtype is not None else jnp.dtype(x.dtype)
    w_t = jnp.transpose(weight, (2, 0, 1)).astype(cdt)            # [K, Cout, Cin]
    if bias is None:
        bias = jnp.zeros((c_out,), dtype=jnp.float32)
    b2 = bias.reshape(c_out, 1)
    out_dtype = x.dtype

    # --- VMEM-budgeted tile sizing (padded sublane x lane footprint) ---------
    w_bytes = k_taps * _tile_bytes(c_out, c_in, cdt)              # resident weights
    hbr = _round_up(halo, 128) if halo > 0 else 0                 # halo block (lane-aligned)
    per_col128 = (2 * _tile_bytes(c_in, 128, x.dtype)             # main in, double-buffered
                  + 2 * _tile_bytes(c_out, 128, out_dtype)        # out, double-buffered
                  + _tile_bytes(c_out, 128, jnp.float32))         # f32 accumulator
    if cdt != jnp.dtype(x.dtype):
        per_col128 += _tile_bytes(c_in, 128, cdt)                 # cast-temp headroom
    fixed = 2 * w_bytes + (2 * _tile_bytes(c_in, hbr, x.dtype) if hbr else 0) + (256 << 10)
    avail = max(_VMEM_BUDGET - fixed, per_col128)
    tt_cap = max(128, (avail // per_col128) * 128)
    if max_tile_cols is not None:
        tt_cap = min(tt_cap, max(128, _round_up(max_tile_cols, 128)))
    tt_cap = min(tt_cap, 8192)

    if max(t_out, t_len) <= tt_cap:
        # --- Path A: one time tile per batch; zero padding done in-kernel ----
        pad_lo = padding
        pad_hi = max(0, t_out - 1 + halo - (t_len - 1) - padding)
        kernel = functools.partial(_conv1d_single_tile_kernel, k_taps=k_taps,
                                   dilation=dilation, pad_lo=pad_lo, pad_hi=pad_hi,
                                   cdt=cdt)
        grid_spec = pltpu.PrefetchScalarGridSpec(
            num_scalar_prefetch=0,
            grid=(b_sz,),
            in_specs=[
                pl.BlockSpec((1, c_in, t_len), lambda b: (b, 0, 0)),
                pl.BlockSpec((k_taps, c_out, c_in), lambda b: (0, 0, 0)),
                pl.BlockSpec((c_out, 1), lambda b: (0, 0)),
            ],
            out_specs=pl.BlockSpec((1, c_out, t_out), lambda b: (b, 0, 0)),
        )
        out = pl.pallas_call(
            kernel,
            out_shape=jax.ShapeDtypeStruct((b_sz, c_out, t_out), out_dtype),
            grid_spec=grid_spec,
            compiler_params=pltpu.CompilerParams(
                dimension_semantics=("parallel",),
                vmem_limit_bytes=_VMEM_LIMIT),
        )(xt, w_t, b2)
    else:
        # --- Path B: tiled time axis, (B, nt) parallel grid -------------------
        tt = tt_cap
        if hbr:
            tt = max((tt // hbr) * hbr, hbr if hbr > halo else 2 * hbr)
        nt = -(-t_out // tt)
        t_x = nt * tt + hbr
        # TODO(synk): this pre-pad is one extra HBM pass over x; replace with
        # clamped left/right-halo BlockSpecs + in-kernel boundary masking.
        xp = jnp.pad(xt, ((0, 0), (0, 0), (padding, t_x - t_len - padding)))

        if halo > 0:
            step = tt // hbr
            kernel = functools.partial(_conv1d_tiled_kernel, k_taps=k_taps,
                                       dilation=dilation, tile_cols=tt, halo=halo,
                                       cdt=cdt)
            in_specs = [
                pl.BlockSpec((1, c_in, tt), lambda b, t: (b, 0, t)),            # main tile
                pl.BlockSpec((1, c_in, hbr), lambda b, t: (b, 0, (t + 1) * step)),  # halo
                pl.BlockSpec((k_taps, c_out, c_in), lambda b, t: (0, 0, 0)),    # weights
                pl.BlockSpec((c_out, 1), lambda b, t: (0, 0)),                  # bias
            ]
            args = (xp, xp, w_t, b2)
        else:
            kernel = functools.partial(_conv1d_pointwise_kernel, cdt=cdt)
            in_specs = [
                pl.BlockSpec((1, c_in, tt), lambda b, t: (b, 0, t)),
                pl.BlockSpec((k_taps, c_out, c_in), lambda b, t: (0, 0, 0)),
                pl.BlockSpec((c_out, 1), lambda b, t: (0, 0)),
            ]
            args = (xp, w_t, b2)

        grid_spec = pltpu.PrefetchScalarGridSpec(
            num_scalar_prefetch=0,
            grid=(b_sz, nt),
            in_specs=in_specs,
            out_specs=pl.BlockSpec((1, c_out, tt), lambda b, t: (b, 0, t)),
        )
        out = pl.pallas_call(
            kernel,
            out_shape=jax.ShapeDtypeStruct((b_sz, c_out, t_out), out_dtype),
            grid_spec=grid_spec,
            compiler_params=pltpu.CompilerParams(
                dimension_semantics=("parallel", "parallel"),
                vmem_limit_bytes=_VMEM_LIMIT),
        )(*args)

    if stride != 1:
        # Conv1d with stride s == stride-1 conv subsampled every s-th frame.
        out = out[:, :, ::stride]

    return jnp.transpose(out, (0, 2, 1)) if transform else out


# --------------------------------------------------------------------------- #
# Reference + tests
# --------------------------------------------------------------------------- #
def _reference_conv(x_cm, weight, bias, *, stride=1, padding=0, dilation=1):
    # x_cm: [B, Cin, T] channel-major, weight: [Cout, Cin, K]
    out = lax.conv_general_dilated(
        x_cm, weight, window_strides=(stride,), padding=[(padding, padding)],
        rhs_dilation=(dilation,), dimension_numbers=("NCH", "OIH", "NCH"))
    return out + bias[None, :, None]


if __name__ == "__main__":
    key = jax.random.PRNGKey(0)
    k1, k2, k3, k4, k5, k6 = jax.random.split(key, 6)

    def check(got, ref, name):
        assert got.shape == ref.shape, (name, got.shape, ref.shape)
        err = float(jnp.max(jnp.abs(got - ref)))
        assert jnp.allclose(got, ref, atol=2e-2, rtol=2e-2), (name, err)

    # 1) Default ConvNorm: transform=False, x=[B, Cin, T], K=3, "same" padding.
    B, C_IN, C_OUT, T, K = 2, 32, 32, 16, 3
    x = jax.random.normal(k1, (B, C_IN, T), jnp.float32)
    w = jax.random.normal(k2, (C_OUT, C_IN, K), jnp.float32) * 0.1
    b = jax.random.normal(k3, (C_OUT,), jnp.float32) * 0.1
    out = conv_norm(x, w, b)                                   # padding None -> 1
    jax.block_until_ready(out)
    check(out, _reference_conv(x, w, b, padding=1), "case1")

    # 1b) stride=2 (handled by subsampling the stride-1 output).
    out_s = conv_norm(x, w, b, stride=2)
    jax.block_until_ready(out_s)
    check(out_s, _reference_conv(x, w, b, stride=2, padding=1), "case1_stride2")

    # 2) transform=True (x=[B, T, Cin]), dilated 5-tap conv.
    K2, DIL = 5, 2
    x2 = jax.random.normal(k4, (B, T, C_IN), jnp.float32)
    w2 = jax.random.normal(k2, (C_OUT, C_IN, K2), jnp.float32) * 0.1
    pad2 = DIL * (K2 - 1) // 2
    out2 = conv_norm(x2, w2, b, dilation=DIL, transform=True)
    jax.block_until_ready(out2)
    ref2 = _reference_conv(jnp.transpose(x2, (0, 2, 1)), w2, b,
                           padding=pad2, dilation=DIL)
    check(out2, jnp.transpose(ref2, (0, 2, 1)), "case2")

    # 3) Tiled path: long sequence, forced small tiles, ragged last tile + halo.
    C3_IN, C3_OUT, T3, K3, DIL3 = 16, 24, 1000, 5, 2
    x3 = jax.random.normal(k5, (B, C3_IN, T3), jnp.float32)
    w3 = jax.random.normal(k6, (C3_OUT, C3_IN, K3), jnp.float32) * 0.1
    b3 = jax.random.normal(k3, (C3_OUT,), jnp.float32) * 0.1
    pad3 = DIL3 * (K3 - 1) // 2
    out3 = conv_norm(x3, w3, b3, dilation=DIL3, max_tile_cols=256)
    jax.block_until_ready(out3)
    check(out3, _reference_conv(x3, w3, b3, padding=pad3, dilation=DIL3), "case3")

    # 4) Tiled pointwise conv (K=1, no-halo branch), bias=None.
    x4 = jax.random.normal(k4, (B, C3_IN, 520), jnp.float32)
    w4 = jax.random.normal(k1, (C3_IN, C3_IN, 1), jnp.float32) * 0.1
    out4 = conv_norm(x4, w4, None, max_tile_cols=256)
    jax.block_until_ready(out4)
    ref4 = lax.conv_general_dilated(x4, w4, (1,), [(0, 0)],
                                    dimension_numbers=("NCH", "OIH", "NCH"))
    check(out4, ref4, "case4")

    print("KERNEL_OK")
</pallas_src>

<mosaic_0001>
module attributes {stable_mosaic.version = 11 : i64} {
  func.func @_conv1d_single_tile_kernel(%arg0: i32, %arg1: memref<1x32x16xf32, #tpu.memory_space<vmem>>, %arg2: memref<3x32x32xf32, #tpu.memory_space<vmem>>, %arg3: memref<32x1xf32, #tpu.memory_space<vmem>>, %arg4: memref<1x32x16xf32, #tpu.memory_space<vmem>>) attributes {dimension_semantics = [#tpu.dimension_semantics<parallel>], iteration_bounds = array<i64: 2>, scalar_prefetch = 0 : i64, scratch_operands = 0 : i64, tpu.core_type = #tpu.core_type<tc>, window_params = [{transform_indices = @transform_0, window_bounds = array<i64: 1, 32, 16>}, {pipeline_mode = #tpu.pipeline_mode<synchronous>, transform_indices = @transform_1, window_bounds = array<i64: 3, 32, 32>}, {pipeline_mode = #tpu.pipeline_mode<synchronous>, transform_indices = @transform_2, window_bounds = array<i64: 32, 1>}, {transform_indices = @transform_3, window_bounds = array<i64: 1, 32, 16>}]} {
    %c0 = arith.constant 0 : index
    %c0_0 = arith.constant 0 : index
    %c0_1 = arith.constant 0 : index
    %0 = vector.load %arg1[%c0, %c0_0, %c0_1] : memref<1x32x16xf32, #tpu.memory_space<vmem>>, vector<1x32x16xf32>
    %1 = vector.shape_cast %0 : vector<1x32x16xf32> to vector<32x16xf32>
    %cst = arith.constant 0.000000e+00 : f32
    %2 = vector.broadcast %cst : f32 to vector<32x1xf32>
    %cst_2 = arith.constant 0.000000e+00 : f32
    %3 = vector.broadcast %cst_2 : f32 to vector<32x1xf32>
    %4 = tpu.concatenate %2, %1, %3 in 1 : vector<32x1xf32>, vector<32x16xf32>, vector<32x1xf32> -> vector<32x18xf32>
    %c0_3 = arith.constant 0 : index
    %c0_4 = arith.constant 0 : index
    %c0_5 = arith.constant 0 : index
    %5 = vector.load %arg2[%c0_3, %c0_4, %c0_5] : memref<3x32x32xf32, #tpu.memory_space<vmem>>, vector<1x32x32xf32>
    %6 = vector.shape_cast %5 : vector<1x32x32xf32> to vector<32x32xf32>
    %7 = vector.extract_strided_slice %4 {offsets = [0, 0], sizes = [32, 16], strides = [1, 1]} : vector<32x18xf32> to vector<32x16xf32>
    %cst_6 = arith.constant dense<0.000000e+00> : vector<32x16xf32>
    %8 = tpu.matmul %6, %7, %cst_6 {dimension_numbers = #tpu.dot_dimension_numbers<[1], [0], [0], [1], [0, 0, 1, 1], [], []>} : vector<32x32xf32>, vector<32x16xf32>, vector<32x16xf32> -> vector<32x16xf32>
    %c1 = arith.constant 1 : index
    %c0_7 = arith.constant 0 : index
    %c0_8 = arith.constant 0 : index
    %9 = vector.load %arg2[%c1, %c0_7, %c0_8] : memref<3x32x32xf32, #tpu.memory_space<vmem>>, vector<1x32x32xf32>
    %10 = vector.shape_cast %9 : vector<1x32x32xf32> to vector<32x32xf32>
    %11 = vector.extract_strided_slice %4 {offsets = [0, 1], sizes = [32, 16], strides = [1, 1]} : vector<32x18xf32> to vector<32x16xf32>
    %cst_9 = arith.constant dense<0.000000e+00> : vector<32x16xf32>
    %12 = tpu.matmul %10, %11, %cst_9 {dimension_numbers = #tpu.dot_dimension_numbers<[1], [0], [0], [1], [0, 0, 1, 1], [], []>} : vector<32x32xf32>, vector<32x16xf32>, vector<32x16xf32> -> vector<32x16xf32>
    %13 = arith.addf %8, %12 : vector<32x16xf32>
    %c2 = arith.constant 2 : index
    %c0_10 = arith.constant 0 : index
    %c0_11 = arith.constant 0 : index
    %14 = vector.load %arg2[%c2, %c0_10, %c0_11] : memref<3x32x32xf32, #tpu.memory_space<vmem>>, vector<1x32x32xf32>
    %15 = vector.shape_cast %14 : vector<1x32x32xf32> to vector<32x32xf32>
    %16 = vector.extract_strided_slice %4 {offsets = [0, 2], sizes = [32, 16], strides = [1, 1]} : vector<32x18xf32> to vector<32x16xf32>
    %cst_12 = arith.constant dense<0.000000e+00> : vector<32x16xf32>
    %17 = tpu.matmul %15, %16, %cst_12 {dimension_numbers = #tpu.dot_dimension_numbers<[1], [0], [0], [1], [0, 0, 1, 1], [], []>} : vector<32x32xf32>, vector<32x16xf32>, vector<32x16xf32> -> vector<32x16xf32>
    %18 = arith.addf %13, %17 : vector<32x16xf32>
    %c0_13 = arith.constant 0 : index
    %c0_14 = arith.constant 0 : index
    %19 = vector.load %arg3[%c0_13, %c0_14] : memref<32x1xf32, #tpu.memory_space<vmem>>, vector<32x1xf32>
    %20 = vector.broadcast %19 : vector<32x1xf32> to vector<32x16xf32>
    %21 = arith.addf %18, %20 : vector<32x16xf32>
    %c0_15 = arith.constant 0 : index
    %c0_16 = arith.constant 0 : index
    %c0_17 = arith.constant 0 : index
    %22 = vector.load %arg4[%c0_15, %c0_16, %c0_17] : memref<1x32x16xf32, #tpu.memory_space<vmem>>, vector<1x32x16xf32>
    %23 = vector.shape_cast %22 : vector<1x32x16xf32> to vector<32x16xf32>
    %24 = vector.shape_cast %21 : vector<32x16xf32> to vector<1x32x16xf32>
    tpu.vector_store %arg4[%c0_15, %c0_16, %c0_17], %24 {strides = array<i32>} : memref<1x32x16xf32, #tpu.memory_space<vmem>>, vector<1x32x16xf32>,
    return
  }
  func.func @transform_0(%arg0: i32) -> (i32, i32, i32) {
    %c0_i32 = arith.constant 0 : i32
    %c0_i32_0 = arith.constant 0 : i32
    %c0_i32_1 = arith.constant 0 : i32
    return %arg0, %c0_i32, %c0_i32_0 : i32, i32, i32
  }
  func.func @transform_1(%arg0: i32) -> (i32, i32, i32) {
    %c0_i32 = arith.constant 0 : i32
    %c0_i32_0 = arith.constant 0 : i32
    %c0_i32_1 = arith.constant 0 : i32
    %c0_i32_2 = arith.constant 0 : i32
    return %c0_i32, %c0_i32_0, %c0_i32_1 : i32, i32, i32
  }
  func.func @transform_2(%arg0: i32) -> (i32, i32) {
    %c0_i32 = arith.constant 0 : i32
    %c0_i32_0 = arith.constant 0 : i32
    %c0_i32_1 = arith.constant 0 : i32
    return %c0_i32, %c0_i32_0 : i32, i32
  }
  func.func @transform_3(%arg0: i32) -> (i32, i32, i32) {
    %c0_i32 = arith.constant 0 : i32
    %c0_i32_0 = arith.constant 0 : i32
    %c0_i32_1 = arith.constant 0 : i32
    return %arg0, %c0_i32, %c0_i32_0 : i32, i32, i32
  }
}

</mosaic_0001>

<bundles_post_ra>
// kernel: tpu_custom_call.1
= control target key start
LH: loop header
LB: loop body
LE: loop exit
PB: predicated region body
PF: predicated region fallthrough
CT: control target
= control target key end

     0   :  { %s846_s12 = smov 0   ;;  %s956_s0 = inlined_call_operand.vmem [shape: f32[2,32,16], index: 0, kind: input, shape index: {}]   ;;  %s957_s1 = inlined_call_operand.vmem [shape: f32[3,32,32], index: 1, kind: input, shape index: {}]   ;;  %s958_s2 = inlined_call_operand.vmem [shape: f32[32,1], index: 2, kind: input, shape index: {}]   ;;  %s959_s3 = inlined_call_operand.vmem [shape: f32[2,32,16], index: 3, kind: output, shape index: {}]  }
   0x1 LB: > { %s627_s13 = sadd.s32 4294967295, %s820_s12   ;;  %p631_p0 = scmp.ge.s32.totalorder %s820_s12, 1  ;;  %s820_s12 = sphi %s846_s12, %s13_s12  }
   0x2   : > { %p137_p1 = scmp.lt.s32.totalorder %s820_s12, 3 }
   0x4   : > { %p138_p2 = pnand %p631_p0, %p137_p1 }
   0x5   : > { %p161_p3 = scmp.lt.s32.totalorder (!%p138_p2), %s627_s13, 1  ;;  %s822_s18 = smov (!%p138_p2), 1   ;;  %v201_v6 = vld [vmem:[%s957_s1] sm:$0xff] (!%p138_p2)  ;;  %vm226_vm0 = vcmask (!%p138_p2), 261120   ;;  %vm191_vm1 = vcmask (!%p138_p2), 7168   ;;  %vm196_vm2 = vcmask (!%p138_p2), 138240  }
   0x6   : > { %141 = sbr.rel (%p138_p2) target bundleno = 494 (0x1ee), region = 32  ;;  %710 = vmatprep.mubr.msk.f32.mxu0 (!%p138_p2), %vm226_vm0, %v201_v6  ;;  %vm870_vm3 = vmpackc.low (!%p138_p2), %vm196_vm2, %vm196_vm2  ;;  %v636_v20 = vld [vmem:[%s957_s1 + $0x20] sm:$0xff] (!%p138_p2)  ;;  %s823_s23 = smov (!%p138_p2), 126   ;;  %v202_v27 = vld [vmem:[%s957_s1 + $0x8] sm:$0xff] (!%p138_p2)  ;;  %v825_v32 = vmov (!%p138_p2), 0   ;;  %vm567_vm4 = vcmask (!%p138_p2), 130048  }
   0x7   : > { %696 = vmatprep.mubr.msk.f32.mxu1 (!%p138_p2), %vm226_vm0, %v636_v20  ;;  %s824_s24 = smov (!%p138_p2), 127   ;;  %v203_v28 = vld [vmem:[%s957_s1 + $0x10] sm:$0xff] (!%p138_p2)  ;;  %v204_v29 = vld [vmem:[%s957_s1 + $0x18] sm:$0xff] (!%p138_p2)  ;;  %v539_v30 = vld [vmem:[%s958_s2] sm:$0xff] (!%p138_p2)  ;;  %812 = vset.pattern.permute.xlu0 (!%p138_p2), %v825_v32 }
   0x8   : > { %v652_v31 = vld [vmem:[%s957_s1 + $0x40] sm:$0xff] (!%p138_p2)  ;;  %813 = vset.pattern.permute.xlu1 (!%p138_p2), %v825_v32  ;;  %v540_v33 = vld [vmem:[%s958_s2 + $0x8] sm:$0xff] (!%p138_p2)  ;;  %v542_v34 = vld [vmem:[%s958_s2 + $0x18] sm:$0xff] (!%p138_p2) }
   0x9   : > { %v541_v35 = vld [vmem:[%s958_s2 + $0x10] sm:$0xff] (!%p138_p2)  ;;  %v637_v51 = vld [vmem:[%s957_s1 + $0x28] sm:$0xff] (!%p138_p2)  ;;  %v639_v54 = vld [vmem:[%s957_s1 + $0x38] sm:$0xff] (!%p138_p2) }
   0xa   : > { %v638_v53 = vld [vmem:[%s957_s1 + $0x30] sm:$0xff] (!%p138_p2)  ;;  %v653_v55 = vld [vmem:[%s957_s1 + $0x48] sm:$0xff] (!%p138_p2)  ;;  %v655_v57 = vld [vmem:[%s957_s1 + $0x58] sm:$0xff] (!%p138_p2) }
   0xb   : > { %v654_v56 = vld [vmem:[%s957_s1 + $0x50] sm:$0xff] (!%p138_p2) }
   0xd   : > { %s963_s13 = smov (!%p161_p3, %s627_s13), 1 }
   0xe   : > { %s662_s14 = sshll.u32 %s963_s13, 5 }
   0xf   : > { %s165_s17 = scalar_lea.vmem %s956_s0, %s662_s14  ;;  %s170_s4 = scalar_lea.vmem %s959_s3, %s662_s14 }
  0x10   : > { %v171_v0 = vld [vmem:[%s165_s17] sm:$0xff]  ;;  %v172_v1 = vld [vmem:[%s165_s17 + $0x8] sm:$0xff]  ;;  %v173_v2 = vld [vmem:[%s165_s17 + $0x10] sm:$0xff] }
  0x11   : > { %v782_v3 = vpack.i.bf16 %v172_v1, %v171_v0  ;;  %v174_v4 = vld [vmem:[%s165_s17 + $0x18] sm:$0xff] }
  0x12   : > { %v787_v5 = vpack.i.bf16 %v174_v4, %v173_v2 }
  0x13   : > { %783 = vrot.lane.b32.xlu0 %v782_v3, %s822_s18 }
  0x17   : > { %788 = vrot.lane.b32.xlu0 %v787_v5, %s822_s18 }
  0x85   : > { %v784_v7 = vpop.permute.xlu0 %783 }
  0x86   : > { %v786_v8 = vunpack.i.h.bf16 %v784_v7  ;;  %v785_v9 = vunpack.i.l.bf16 %v784_v7 }
  0x88   : > { %v192_v10 = vsel %vm191_vm1, 0.0, %v785_v9  ;;  %v193_v11 = vsel %vm191_vm1, 0.0, %v786_v8 }
  0x89   : > { %v789_v13 = vpop.permute.xlu0 %788  ;;  %v197_v14 = vsel %vm196_vm2, %v192_v10, 0.0  ;;  %v198_v15 = vsel %vm196_vm2, %v193_v11, 0.0  ;;  %v738_v16 = vpack.c.bf16 %v193_v11, %v192_v10 }
  0x8a   : > { %v791_v17 = vunpack.i.h.bf16 %v789_v13  ;;  %v790_v18 = vunpack.i.l.bf16 %v789_v13  ;;  %v802_v19 = vpack.i.bf16 %v198_v15, %v197_v14 }
  0x8b   : > { %740 = vmatprep.subr.msk.bf16.mxu0 %vm870_vm3, %v738_v16 }
  0x8c   : > { %v195_v21 = vsel %vm191_vm1, 0.0, %v791_v17  ;;  %v194_v22 = vsel %vm191_vm1, 0.0, %v790_v18  ;;  %743 = vmatpush3.bf16.msk.msra.mxu0 %vm870_vm3, %v738_v16  ;;  %803 = vrot.lane.b32.xlu0 %v802_v19, %s823_s23 }
  0x8d   : > { %v200_v23 = vsel %vm196_vm2, %v195_v21, 0.0  ;;  %v199_v24 = vsel %vm196_vm2, %v194_v22, 0.0  ;;  %v744_v25 = vpack.c.bf16 %v195_v21, %v194_v22  ;;  %793 = vrot.lane.b32.xlu1 %v802_v19, %s824_s24 }
  0x8e   : > { %v797_v26 = vpack.i.bf16 %v200_v23, %v199_v24 }
  0x8f   : > { %746 = vmatprep.subr.msk.bf16.mxu0 %vm870_vm3, %v744_v25 }
  0x90   : > { %749 = vmatpush3.bf16.msk.msra.mxu0 %vm870_vm3, %v744_v25  ;;  %545 = vperm.xlu0 %812, %v539_v30  }
  0x91   : > { %798 = vrot.lane.b32.xlu1 %v797_v26, %s824_s24 }
  0x93   : > { %711 = vmatmul.mubr.msk.f32.vlgmr.msra.gmra.mrb[0].mxu0 %vm226_vm0, %v202_v27 }
  0x94   : > { %713 = vmatprep.mubr.msk.f32.mxu0 %vm226_vm0, %v203_v28  ;;  %560 = vperm.xlu0 %812, %v542_v34  }
  0x95   : > { %808 = vrot.lane.b32.xlu1 %v797_v26, %s823_s23 }
  0x97   : > { %714 = vmatmul.mubr.msk.f32.gmra.mrb[2].mxu0 %vm226_vm0, %v204_v29 }
  0x98   : > { %724 = vmatprep.mubr.msk.f32.mxu0 %vm226_vm0, %v652_v31 }
  0x99   : > { %550 = vperm.xlu1 %813, %v540_v33  }
  0x9d   : > { %555 = vperm.xlu1 %813, %v541_v35  }
  0xfe   : > { %v804_v36 = vpop.permute.xlu0 %803 }
  0xff   : > { %v806_v37 = vunpack.i.h.bf16 %v804_v36  ;;  %v805_v38 = vunpack.i.l.bf16 %v804_v36  ;;  %v794_v39 = vpop.permute.xlu1 %793 }
 0x100   : > { %v796_v40 = vunpack.i.h.bf16 %v794_v39  ;;  %v795_v41 = vunpack.i.l.bf16 %v794_v39 }
 0x101   : > { %v750_v42 = vpack.c.bf16 %v806_v37, %v805_v38 }
 0x102   : > { %v730_v43 = vpack.c.bf16 %v796_v40, %v795_v41 }
 0x103   : > { %v799_v44 = vpop.permute.xlu1 %798  ;;  %751 = vmatprep.subr.bf16.mxu0 %v750_v42 }
 0x104   : > { %v801_v45 = vunpack.i.h.bf16 %v799_v44  ;;  %v800_v46 = vunpack.i.l.bf16 %v799_v44  ;;  %731 = vmatprep.subr.bf16.mxu1 %v730_v43  ;;  %753 = vmatpush3.bf16.msra.mxu0 %v750_v42 }
 0x105   : > { %733 = vmatpush3.bf16.msra.mxu1 %v730_v43 }
 0x106   : > { %v734_v47 = vpack.c.bf16 %v801_v45, %v800_v46 }
 0x107   : > { %v809_v48 = vpop.permute.xlu1 %808 }
 0x108   : > { %v811_v49 = vunpack.i.h.bf16 %v809_v48  ;;  %v810_v50 = vunpack.i.l.bf16 %v809_v48  ;;  %735 = vmatprep.subr.bf16.mxu1 %v734_v47 }
 0x109   : > { %737 = vmatpush3.bf16.msra.mxu1 %v734_v47 }
 0x10a   : > { %v754_v52 = vpack.c.bf16 %v811_v49, %v810_v50  ;;  %758 = vmatprep.subr.bf16.mxu1 %v750_v42 }
 0x10c   : > { %697 = vmatmul.mubr.msk.f32.vlgmr.msra.gmra.mrb[0].mxu1 %vm226_vm0, %v637_v51  ;;  %755 = vmatprep.subr.bf16.mxu0 %v754_v52 }
 0x10d   : > { %760 = vmatpush3.bf16.msra.mxu1 %v750_v42  ;;  %757 = vmatpush3.bf16.msra.mxu0 %v754_v52 }
 0x10e   : > { %759 = vmatprep.subr.bf16.mxu1 %v754_v52  ;;  %699 = vmatprep.mubr.msk.f32.mxu1 %vm226_vm0, %v638_v53 }
 0x10f   : > { %v546_v62 = vpop.permute.xlu0 %545 }
 0x110   : > { %700 = vmatmul.mubr.msk.f32.gmra.mrb[2].mxu1 %vm226_vm0, %v639_v54  ;;  %725 = vmatmul.mubr.msk.f32.vlgmr.msra.gmra.mrb[0].mxu0 %vm226_vm0, %v653_v55 }
 0x111   : > { %761 = vmatpush3.bf16.msra.mxu1 %v754_v52  ;;  %727 = vmatprep.mubr.msk.f32.mxu1 %vm226_vm0, %v654_v56 }
 0x113   : > { %v561_v13 = vpop.permute.xlu0 %560 }
 0x114   : > { %728 = vmatmul.mubr.msk.f32.vlgmr.msra.gmra.mrb[4].mxu1 %vm226_vm0, %v655_v57 }
 0x118   : > { %v551_v63 = vpop.permute.xlu1 %550 }
 0x11c   : > { %v556_v15 = vpop.permute.xlu1 %555 }
 0x16a   : > { %v715_v58 = vpop.f32.mrb[2].mxu0 }
 0x16b   : > { %v412_v59 = vpop.f32.mrb[3].mxu0 }
 0x1df   : > { %v698_v60 = vpop.f32.mrb[0].mxu1 }
 0x1e0   : > { %v305_v61 = vpop.f32.mrb[1].mxu1 }
 0x1e3   : > { %v701_v0 = vpop.f32.mrb[2].mxu1  ;;  %v726_v1 = vpop.f32.mrb[0].mxu0 }
 0x1e4   : > { %v418_v2 = vadd.f32 %v715_v58, %v701_v0  ;;  %v762_v3 = vadd.f32 %v726_v1, %v698_v60  ;;  %v315_v4 = vpop.f32.mrb[3].mxu1  ;;  %v516_v5 = vpop.f32.mrb[1].mxu0 }
 0x1e5   : > { %v413_v6 = vadd.f32 %v412_v59, %v315_v4  ;;  %v763_v7 = vadd.f32 %v516_v5, %v305_v61 }
 0x1e6   : > { %v564_v8 = vadd.f32 %v762_v3, %v551_v63 }
 0x1e7   : > { %v563_v9 = vadd.f32 %v763_v7, %v546_v62  ;;  %v729_v10 = vpop.f32.mrb[4].mxu1 }
 0x1e8   : > { %569 = vst.msk [vmem:[%s170_s4 + $0x8] sm:$0xff] %vm567_vm4, %v564_v8  ;;  %v538_v11 = vadd.f32 %v729_v10, %v418_v2  ;;  %v526_v12 = vpop.f32.mrb[5].mxu1 }
 0x1e9   : > { %568 = vst.msk [vmem:[%s170_s4] sm:$0xff] %vm567_vm4, %v563_v9  ;;  %v537_v14 = vadd.f32 %v526_v12, %v413_v6 }
 0x1ea   : > { %v566_v16 = vadd.f32 %v561_v13, %v538_v11 }
 0x1eb   : > { %v565_v17 = vadd.f32 %v556_v15, %v537_v14 }
 0x1ec   : > { %571 = vst.msk [vmem:[%s170_s4 + $0x18] sm:$0xff] %vm567_vm4, %v566_v16 }
 0x1ed   : > { %570 = vst.msk [vmem:[%s170_s4 + $0x10] sm:$0xff] %vm567_vm4, %v565_v17 }
 0x1ee PF: > { %s13_s12 = sadd.s32 1, %s820_s12  }
 0x1ef   : > { %p10_p4 = scmp.ge.s32.totalorder %s13_s12, 4  }
 0x1f1   :  { %12 = sbr.rel (!%p10_p4) target bundleno = 1 (0x1), region = 64 }

</bundles_post_ra>
